<compile_context>
chip_gen: v7x
topology: tpu7x:2x2x1
jax: 0.10.0
libtpu: 0.0.40
codegen_flags: <defaults>
</compile_context>

<pallas_src>
import functools

import numpy as np
import jax
import jax.numpy as jnp
from jax.experimental import pallas as pl
from jax.experimental.pallas import tpu as pltpu


# Pyramid._filter_dict['gauss5x5'] (exact constants from the PyTorch module)
_GAUSS5X5 = (
    (0.003765, 0.015019, 0.023792, 0.015019, 0.003765),
    (0.015019, 0.059912, 0.094907, 0.059912, 0.015019),
    (0.023792, 0.094907, 0.150342, 0.094907, 0.023792),
    (0.015019, 0.059912, 0.094907, 0.059912, 0.015019),
    (0.003765, 0.015019, 0.023792, 0.015019, 0.003765),
)


def _round_up(x, m):
    return (x + m - 1) // m * m


def _vmem_limit_bytes(est_bytes):
    # Explicit scoped-VMEM budget (v5e default is only 16 MiB).  Cap at 48 MiB so v7x
    # (64 MiB physical VMEM) keeps headroom for Mosaic internal scratch.
    return int(min(max(2 * est_bytes + (4 << 20), 16 << 20), 48 << 20))


@functools.lru_cache(maxsize=None)
def _blur_operator_t(h, w, p_pad, filt=_GAUSS5X5):
    """(P_pad, P_pad) matrix M such that smooth_flat = img_flat @ M is exactly the
    zero-padded depthwise F.conv2d(img, gauss5x5, padding=2).  Compile-time numpy
    constant (depends only on H, W and the fixed filter taps, not on params/inputs)."""
    f = np.asarray(filt, np.float32)
    ksz = f.shape[0]
    pad = ksz // 2
    p = h * w
    g = np.zeros((p, p), np.float32)          # g[out_pixel, in_pixel]
    for i in range(ksz):
        for j in range(ksz):
            dy, dx = i - pad, j - pad
            for y in range(h):
                yy = y + dy
                if not 0 <= yy < h:
                    continue
                for x in range(w):
                    xx = x + dx
                    if 0 <= xx < w:
                        g[y * w + x, yy * w + xx] += f[i, j]
    gt = np.zeros((p_pad, p_pad), np.float32)
    gt[:p, :p] = g.T                          # right-multiply form: smooth = img @ G^T
    return gt


def build_bilinear_sample_matrix(grid_pts, h, w):
    """Dense (N, H*W) matrix equivalent to F.grid_sample(..., mode='bilinear',
    align_corners=True) with a batch-shared grid already clamped to [-1, 1].
    Note: when a grid point sits exactly on +1, one_hot(x0i+1, w) is all-zeros; this is
    correct because the associated bilinear weight (wx1/wy1) is exactly 0 there."""
    gx = (grid_pts[:, 0] + 1.0) * 0.5 * (w - 1)     # grid[...,0] -> width index
    gy = (grid_pts[:, 1] + 1.0) * 0.5 * (h - 1)     # grid[...,1] -> height index
    x0 = jnp.floor(gx)
    y0 = jnp.floor(gy)
    wx1 = gx - x0
    wy1 = gy - y0
    x0i = x0.astype(jnp.int32)
    y0i = y0.astype(jnp.int32)
    ohx = (jax.nn.one_hot(x0i, w, dtype=jnp.float32) * (1.0 - wx1)[:, None]
           + jax.nn.one_hot(x0i + 1, w, dtype=jnp.float32) * wx1[:, None])
    ohy = (jax.nn.one_hot(y0i, h, dtype=jnp.float32) * (1.0 - wy1)[:, None]
           + jax.nn.one_hot(y0i + 1, h, dtype=jnp.float32) * wy1[:, None])
    s = ohy[:, :, None] * ohx[:, None, :]           # (N, H, W), 4 non-zeros per point
    return s.reshape(grid_pts.shape[0], h * w)


# ----------------------------------------------------------------------------
# Fused kernel: pyramid (MXU blur-operator matmuls) + grid_sample matmul +
# feature-weighted channel reduction + bias.  One grid step per batch image.
# ----------------------------------------------------------------------------
def _make_fused_kernel(scale_n, c, n_pad):
    def kernel(x_ref, gt_ref, st_ref, feat_ref, bias_ref, o_ref):
        # x_ref:   (C, Ppad)    one image, flattened, lane-dense
        # gt_ref:  (Ppad, Ppad) blur operator (right-multiply), DMA'd once
        # st_ref:  (Ppad, Npad) S^T bilinear sampling matrix, DMA'd once
        # feat_ref:(Q, Npad)    features;  bias_ref / o_ref: (1, Npad)
        img = x_ref[...].astype(jnp.float32)
        gt = gt_ref[...]
        st = st_ref[...]
        acc = jnp.zeros((1, n_pad), jnp.float32)
        for lvl in range(scale_n + 1):            # static unroll, scale_n+1 levels
            if lvl < scale_n:
                smooth = jnp.dot(img, gt, preferred_element_type=jnp.float32)
                level = img - smooth              # high-pass residual hi_lvl
            else:
                level = img                       # final low-pass level
            pools = jnp.dot(level, st, preferred_element_type=jnp.float32)  # (C, Npad)
            acc = acc + jnp.sum(pools * feat_ref[lvl * c:(lvl + 1) * c, :],
                                axis=0, keepdims=True)
            if lvl < scale_n:
                img = smooth
        o_ref[...] = (acc + bias_ref[...]).astype(o_ref.dtype)

    return kernel


def point_pyramid_2d_forward(x, grid, features, bias=None, *, scale_n=4,
                             downsample=False, positive=False, align_corners=True):
    """Functional PointPyramid2d.forward (type='gauss5x5', shift=None)."""
    if downsample:
        # TODO(synk): downsample=True path (stride-2 decimation + 4*conv_transpose2d
        # upsampling inside Pyramid.lap_split) is not implemented in Pallas.
        raise NotImplementedError("downsample=True is not supported")
    if not align_corners:
        # TODO(synk): align_corners=False pixel-center coordinate convention.
        raise NotImplementedError("align_corners=False is not supported")
    b, c, h, w = x.shape
    n = features.shape[-1]
    p = h * w
    q = (scale_n + 1) * c

    feat = features.reshape(q, n).astype(jnp.float32)
    if positive:
        feat = jnp.maximum(feat, 0.0)                   # torch `positive(features)`
    g_pts = jnp.clip(grid.reshape(n, 2), -1.0, 1.0)     # forward clamps grid to [-1,1]

    n_pad = _round_up(n, 128)                           # lane-dense output / matmul N
    p_pad = _round_up(p, 128)                           # lane-dense reduction dim

    gt = jnp.asarray(_blur_operator_t(h, w, p_pad))     # (Ppad, Ppad), compile-time const

    st = build_bilinear_sample_matrix(g_pts, h, w).T    # (P, N)
    if p_pad != p or n_pad != n:
        st = jnp.pad(st, ((0, p_pad - p), (0, n_pad - n)))
    feat_p = feat if n_pad == n else jnp.pad(feat, ((0, 0), (0, n_pad - n)))
    bias_v = (bias if bias is not None else jnp.zeros((n,), jnp.float32)).astype(jnp.float32)
    bias_p = (bias_v if n_pad == n else jnp.pad(bias_v, (0, n_pad - n))).reshape(1, n_pad)

    x_flat = x.reshape(b, c, p)                         # free reshape (contiguous)
    if p_pad != p:
        x_flat = jnp.pad(x_flat, ((0, 0), (0, 0), (0, p_pad - p)))

    est = 4 * (c * p_pad + p_pad * p_pad + p_pad * n_pad + (q + 2) * n_pad)
    out = pl.pallas_call(
        _make_fused_kernel(scale_n, c, n_pad),
        out_shape=jax.ShapeDtypeStruct((b, 1, n_pad), x.dtype),
        grid_spec=pltpu.PrefetchScalarGridSpec(
            num_scalar_prefetch=0,
            grid=(b,),
            in_specs=[
                pl.BlockSpec((pl.Squeezed(), c, p_pad), lambda i: (i, 0, 0)),  # image
                pl.BlockSpec((p_pad, p_pad), lambda i: (0, 0)),   # blur operator (once)
                pl.BlockSpec((p_pad, n_pad), lambda i: (0, 0)),   # S^T (once)
                pl.BlockSpec((q, n_pad), lambda i: (0, 0)),       # features (once)
                pl.BlockSpec((1, n_pad), lambda i: (0, 0)),       # bias (once)
            ],
            out_specs=pl.BlockSpec((pl.Squeezed(), 1, n_pad), lambda i: (i, 0, 0)),
        ),
        compiler_params=pltpu.CompilerParams(
            dimension_semantics=("parallel",),               # >=2-wide for v7x's 2 TCs
            vmem_limit_bytes=_vmem_limit_bytes(est),
        ),
    )(x_flat, gt, st, feat_p, bias_p)
    return out[:, 0, :n]


# ----------------------------------------------------------------------------
# Pure-JAX reference (direct 25-tap conv + gather-based grid_sample)
# ----------------------------------------------------------------------------
def _reference_forward(x, grid, features, bias, *, scale_n=4, positive=False):
    b, c, h, w = x.shape
    n = features.shape[-1]
    feat = features.reshape(-1, n)
    if positive:
        feat = jnp.maximum(feat, 0.0)
    g = jnp.clip(grid.reshape(n, 2), -1.0, 1.0)
    filt = jnp.asarray(_GAUSS5X5, jnp.float32)
    ksz = filt.shape[0]
    pad = ksz // 2

    levels = []
    img = x
    for _ in range(scale_n):
        xp = jnp.pad(img, ((0, 0), (0, 0), (pad, pad), (pad, pad)))
        sm = jnp.zeros_like(img)
        for dy in range(ksz):
            for dx in range(ksz):
                sm = sm + filt[dy, dx] * xp[:, :, dy:dy + h, dx:dx + w]
        levels.append(img - sm)
        img = sm
    levels.append(img)
    lvl = jnp.concatenate(levels, axis=1)              # (B, Q, H, W)

    gx = (g[:, 0] + 1.0) * 0.5 * (w - 1)
    gy = (g[:, 1] + 1.0) * 0.5 * (h - 1)
    x0 = jnp.floor(gx)
    y0 = jnp.floor(gy)
    wx1 = gx - x0
    wy1 = gy - y0
    x0i = jnp.clip(x0.astype(jnp.int32), 0, w - 1)
    x1i = jnp.clip(x0i + 1, 0, w - 1)
    y0i = jnp.clip(y0.astype(jnp.int32), 0, h - 1)
    y1i = jnp.clip(y0i + 1, 0, h - 1)
    p00 = lvl[:, :, y0i, x0i]
    p01 = lvl[:, :, y0i, x1i]
    p10 = lvl[:, :, y1i, x0i]
    p11 = lvl[:, :, y1i, x1i]
    pools = ((1 - wy1) * (1 - wx1) * p00 + (1 - wy1) * wx1 * p01
             + wy1 * (1 - wx1) * p10 + wy1 * wx1 * p11)        # (B, Q, N)
    return jnp.sum(pools * feat[None], axis=1) + bias


if __name__ == "__main__":
    # Module config: in_shape=(4, 16, 16), outdims=32, scale_n=4, type='gauss5x5',
    # downsample=False, bias=True, positive=False, init_range=0.9, align_corners=True.
    B, C, H, W = 2, 4, 16, 16
    OUTDIMS = 32
    SCALE_N = 4
    INIT_RANGE = 0.9

    key = jax.random.PRNGKey(0)
    kx, kg, kf, kb = jax.random.split(key, 4)

    x = jax.random.normal(kx, (B, C, H, W), dtype=jnp.float32)
    # Parameters with the PyTorch module's shapes.
    grid = jax.random.uniform(kg, (1, OUTDIMS, 1, 2), dtype=jnp.float32,
                              minval=-INIT_RANGE, maxval=INIT_RANGE)
    features = jax.random.normal(kf, (1, C * (SCALE_N + 1), 1, OUTDIMS),
                                 dtype=jnp.float32) * 0.5
    bias = jax.random.normal(kb, (OUTDIMS,), dtype=jnp.float32) * 0.1

    out = point_pyramid_2d_forward(x, grid, features, bias, scale_n=SCALE_N,
                                   downsample=False, positive=False,
                                   align_corners=True)
    out = jax.block_until_ready(out)

    ref = _reference_forward(x, grid, features, bias, scale_n=SCALE_N, positive=False)
    assert out.shape == (B, OUTDIMS)
    max_err = float(jnp.max(jnp.abs(out - ref)))
    assert jnp.allclose(out, ref, atol=1e-3, rtol=1e-3), max_err

    print("KERNEL_OK")
</pallas_src>

<mosaic_0001>
module attributes {stable_mosaic.version = 11 : i64} {
  func.func @kernel(%arg0: i32, %arg1: memref<1x4x256xf32, #tpu.memory_space<vmem>>, %arg2: memref<256x256xf32, #tpu.memory_space<vmem>>, %arg3: memref<256x128xf32, #tpu.memory_space<vmem>>, %arg4: memref<20x128xf32, #tpu.memory_space<vmem>>, %arg5: memref<1x128xf32, #tpu.memory_space<vmem>>, %arg6: memref<1x1x128xf32, #tpu.memory_space<vmem>>) attributes {dimension_semantics = [#tpu.dimension_semantics<parallel>], iteration_bounds = array<i64: 2>, scalar_prefetch = 0 : i64, scratch_operands = 0 : i64, tpu.core_type = #tpu.core_type<tc>, window_params = [{transform_indices = @transform_0, window_bounds = array<i64: 1, 4, 256>}, {pipeline_mode = #tpu.pipeline_mode<synchronous>, transform_indices = @transform_1, window_bounds = array<i64: 256, 256>}, {pipeline_mode = #tpu.pipeline_mode<synchronous>, transform_indices = @transform_2, window_bounds = array<i64: 256, 128>}, {pipeline_mode = #tpu.pipeline_mode<synchronous>, transform_indices = @transform_3, window_bounds = array<i64: 20, 128>}, {pipeline_mode = #tpu.pipeline_mode<synchronous>, transform_indices = @transform_4, window_bounds = array<i64: 1, 128>}, {transform_indices = @transform_5, window_bounds = array<i64: 1, 1, 128>}]} {
    %c0 = arith.constant 0 : index
    %c0_0 = arith.constant 0 : index
    %c0_1 = arith.constant 0 : index
    %0 = vector.load %arg1[%c0, %c0_0, %c0_1] : memref<1x4x256xf32, #tpu.memory_space<vmem>>, vector<1x4x256xf32>
    %1 = vector.shape_cast %0 : vector<1x4x256xf32> to vector<4x256xf32>
    %c0_2 = arith.constant 0 : index
    %c0_3 = arith.constant 0 : index
    %2 = vector.load %arg2[%c0_2, %c0_3] : memref<256x256xf32, #tpu.memory_space<vmem>>, vector<256x256xf32>
    %c0_4 = arith.constant 0 : index
    %c0_5 = arith.constant 0 : index
    %3 = vector.load %arg3[%c0_4, %c0_5] : memref<256x128xf32, #tpu.memory_space<vmem>>, vector<256x128xf32>
    %cst = arith.constant 0.000000e+00 : f32
    %4 = vector.broadcast %cst : f32 to vector<1x128xf32>
    %cst_6 = arith.constant dense<0.000000e+00> : vector<4x256xf32>
    %5 = tpu.matmul %1, %2, %cst_6 {dimension_numbers = #tpu.dot_dimension_numbers<[1], [0], [0], [1], [0, 0, 1, 1], [], []>} : vector<4x256xf32>, vector<256x256xf32>, vector<4x256xf32> -> vector<4x256xf32>
    %6 = arith.subf %1, %5 : vector<4x256xf32>
    %cst_7 = arith.constant dense<0.000000e+00> : vector<4x128xf32>
    %7 = tpu.matmul %6, %3, %cst_7 {dimension_numbers = #tpu.dot_dimension_numbers<[1], [0], [0], [1], [0, 0, 1, 1], [], []>} : vector<4x256xf32>, vector<256x128xf32>, vector<4x128xf32> -> vector<4x128xf32>
    %c0_8 = arith.constant 0 : index
    %c0_9 = arith.constant 0 : index
    %8 = vector.load %arg4[%c0_8, %c0_9] : memref<20x128xf32, #tpu.memory_space<vmem>>, vector<4x128xf32>
    %9 = arith.mulf %7, %8 : vector<4x128xf32>
    %cst_10 = arith.constant dense<0.000000e+00> : vector<128xf32>
    %10 = vector.multi_reduction <add>, %9, %cst_10 [0] : vector<4x128xf32> to vector<128xf32>
    %11 = vector.shape_cast %10 : vector<128xf32> to vector<1x128xf32>
    %12 = arith.addf %4, %11 : vector<1x128xf32>
    %cst_11 = arith.constant dense<0.000000e+00> : vector<4x256xf32>
    %13 = tpu.matmul %5, %2, %cst_11 {dimension_numbers = #tpu.dot_dimension_numbers<[1], [0], [0], [1], [0, 0, 1, 1], [], []>} : vector<4x256xf32>, vector<256x256xf32>, vector<4x256xf32> -> vector<4x256xf32>
    %14 = arith.subf %5, %13 : vector<4x256xf32>
    %cst_12 = arith.constant dense<0.000000e+00> : vector<4x128xf32>
    %15 = tpu.matmul %14, %3, %cst_12 {dimension_numbers = #tpu.dot_dimension_numbers<[1], [0], [0], [1], [0, 0, 1, 1], [], []>} : vector<4x256xf32>, vector<256x128xf32>, vector<4x128xf32> -> vector<4x128xf32>
    %c4 = arith.constant 4 : index
    %c0_13 = arith.constant 0 : index
    %16 = vector.load %arg4[%c4, %c0_13] : memref<20x128xf32, #tpu.memory_space<vmem>>, vector<4x128xf32>
    %17 = arith.mulf %15, %16 : vector<4x128xf32>
    %cst_14 = arith.constant dense<0.000000e+00> : vector<128xf32>
    %18 = vector.multi_reduction <add>, %17, %cst_14 [0] : vector<4x128xf32> to vector<128xf32>
    %19 = vector.shape_cast %18 : vector<128xf32> to vector<1x128xf32>
    %20 = arith.addf %12, %19 : vector<1x128xf32>
    %cst_15 = arith.constant dense<0.000000e+00> : vector<4x256xf32>
    %21 = tpu.matmul %13, %2, %cst_15 {dimension_numbers = #tpu.dot_dimension_numbers<[1], [0], [0], [1], [0, 0, 1, 1], [], []>} : vector<4x256xf32>, vector<256x256xf32>, vector<4x256xf32> -> vector<4x256xf32>
    %22 = arith.subf %13, %21 : vector<4x256xf32>
    %cst_16 = arith.constant dense<0.000000e+00> : vector<4x128xf32>
    %23 = tpu.matmul %22, %3, %cst_16 {dimension_numbers = #tpu.dot_dimension_numbers<[1], [0], [0], [1], [0, 0, 1, 1], [], []>} : vector<4x256xf32>, vector<256x128xf32>, vector<4x128xf32> -> vector<4x128xf32>
    %c8 = arith.constant 8 : index
    %c0_17 = arith.constant 0 : index
    %24 = vector.load %arg4[%c8, %c0_17] : memref<20x128xf32, #tpu.memory_space<vmem>>, vector<4x128xf32>
    %25 = arith.mulf %23, %24 : vector<4x128xf32>
    %cst_18 = arith.constant dense<0.000000e+00> : vector<128xf32>
    %26 = vector.multi_reduction <add>, %25, %cst_18 [0] : vector<4x128xf32> to vector<128xf32>
    %27 = vector.shape_cast %26 : vector<128xf32> to vector<1x128xf32>
    %28 = arith.addf %20, %27 : vector<1x128xf32>
    %cst_19 = arith.constant dense<0.000000e+00> : vector<4x256xf32>
    %29 = tpu.matmul %21, %2, %cst_19 {dimension_numbers = #tpu.dot_dimension_numbers<[1], [0], [0], [1], [0, 0, 1, 1], [], []>} : vector<4x256xf32>, vector<256x256xf32>, vector<4x256xf32> -> vector<4x256xf32>
    %30 = arith.subf %21, %29 : vector<4x256xf32>
    %cst_20 = arith.constant dense<0.000000e+00> : vector<4x128xf32>
    %31 = tpu.matmul %30, %3, %cst_20 {dimension_numbers = #tpu.dot_dimension_numbers<[1], [0], [0], [1], [0, 0, 1, 1], [], []>} : vector<4x256xf32>, vector<256x128xf32>, vector<4x128xf32> -> vector<4x128xf32>
    %c12 = arith.constant 12 : index
    %c0_21 = arith.constant 0 : index
    %32 = vector.load %arg4[%c12, %c0_21] : memref<20x128xf32, #tpu.memory_space<vmem>>, vector<4x128xf32>
    %33 = arith.mulf %31, %32 : vector<4x128xf32>
    %cst_22 = arith.constant dense<0.000000e+00> : vector<128xf32>
    %34 = vector.multi_reduction <add>, %33, %cst_22 [0] : vector<4x128xf32> to vector<128xf32>
    %35 = vector.shape_cast %34 : vector<128xf32> to vector<1x128xf32>
    %36 = arith.addf %28, %35 : vector<1x128xf32>
    %cst_23 = arith.constant dense<0.000000e+00> : vector<4x128xf32>
    %37 = tpu.matmul %29, %3, %cst_23 {dimension_numbers = #tpu.dot_dimension_numbers<[1], [0], [0], [1], [0, 0, 1, 1], [], []>} : vector<4x256xf32>, vector<256x128xf32>, vector<4x128xf32> -> vector<4x128xf32>
    %c16 = arith.constant 16 : index
    %c0_24 = arith.constant 0 : index
    %38 = vector.load %arg4[%c16, %c0_24] : memref<20x128xf32, #tpu.memory_space<vmem>>, vector<4x128xf32>
    %39 = arith.mulf %37, %38 : vector<4x128xf32>
    %cst_25 = arith.constant dense<0.000000e+00> : vector<128xf32>
    %40 = vector.multi_reduction <add>, %39, %cst_25 [0] : vector<4x128xf32> to vector<128xf32>
    %41 = vector.shape_cast %40 : vector<128xf32> to vector<1x128xf32>
    %42 = arith.addf %36, %41 : vector<1x128xf32>
    %c0_26 = arith.constant 0 : index
    %c0_27 = arith.constant 0 : index
    %43 = vector.load %arg5[%c0_26, %c0_27] : memref<1x128xf32, #tpu.memory_space<vmem>>, vector<1x128xf32>
    %44 = arith.addf %42, %43 : vector<1x128xf32>
    %c0_28 = arith.constant 0 : index
    %c0_29 = arith.constant 0 : index
    %c0_30 = arith.constant 0 : index
    %45 = vector.load %arg6[%c0_28, %c0_29, %c0_30] : memref<1x1x128xf32, #tpu.memory_space<vmem>>, vector<1x1x128xf32>
    %46 = vector.shape_cast %45 : vector<1x1x128xf32> to vector<1x128xf32>
    %47 = vector.shape_cast %44 : vector<1x128xf32> to vector<1x1x128xf32>
    tpu.vector_store %arg6[%c0_28, %c0_29, %c0_30], %47 {strides = array<i32>} : memref<1x1x128xf32, #tpu.memory_space<vmem>>, vector<1x1x128xf32>,
    return
  }
  func.func @transform_0(%arg0: i32) -> (i32, i32, i32) {
    %c0_i32 = arith.constant 0 : i32
    %c0_i32_0 = arith.constant 0 : i32
    %c0_i32_1 = arith.constant 0 : i32
    return %arg0, %c0_i32, %c0_i32_0 : i32, i32, i32
  }
  func.func @transform_1(%arg0: i32) -> (i32, i32) {
    %c0_i32 = arith.constant 0 : i32
    %c0_i32_0 = arith.constant 0 : i32
    %c0_i32_1 = arith.constant 0 : i32
    return %c0_i32, %c0_i32_0 : i32, i32
  }
  func.func @transform_2(%arg0: i32) -> (i32, i32) {
    %c0_i32 = arith.constant 0 : i32
    %c0_i32_0 = arith.constant 0 : i32
    %c0_i32_1 = arith.constant 0 : i32
    return %c0_i32, %c0_i32_0 : i32, i32
  }
  func.func @transform_3(%arg0: i32) -> (i32, i32) {
    %c0_i32 = arith.constant 0 : i32
    %c0_i32_0 = arith.constant 0 : i32
    %c0_i32_1 = arith.constant 0 : i32
    return %c0_i32, %c0_i32_0 : i32, i32
  }
  func.func @transform_4(%arg0: i32) -> (i32, i32) {
    %c0_i32 = arith.constant 0 : i32
    %c0_i32_0 = arith.constant 0 : i32
    %c0_i32_1 = arith.constant 0 : i32
    return %c0_i32, %c0_i32_0 : i32, i32
  }
  func.func @transform_5(%arg0: i32) -> (i32, i32, i32) {
    %c0_i32 = arith.constant 0 : i32
    %c0_i32_0 = arith.constant 0 : i32
    %c0_i32_1 = arith.constant 0 : i32
    return %arg0, %c0_i32, %c0_i32_0 : i32, i32, i32
  }
}

</mosaic_0001>

<bundles_post_ra>
// kernel: tpu_custom_call.1
= control target key start
LH: loop header
LB: loop body
LE: loop exit
PB: predicated region body
PF: predicated region fallthrough
CT: control target
= control target key end

     0   :  { %10 = vsyncpa [#allocation3], 0  ;;  %s2707_s0 = inlined_call_operand.hbm [shape: f32[2,4,256], index: 0, kind: input, shape index: {}]   ;;  %s2708_s1 = inlined_call_operand.hbm [shape: f32[256,256], index: 1, kind: input, shape index: {}]   ;;  %s2709_s2 = inlined_call_operand.hbm [shape: f32[256,128], index: 2, kind: input, shape index: {}]   ;;  %s2710_s3 = inlined_call_operand.hbm [shape: f32[20,128], index: 3, kind: input, shape index: {}]   ;;  %s2711_s4 = inlined_call_operand.vmem [shape: f32[1,128], index: 4, kind: input, shape index: {}]   ;;  %s2712_s5 = inlined_call_operand.hbm [shape: f32[2,1,128], index: 5, kind: output, shape index: {}]  }
   0x1   :  { %12 = vsyncpa [#allocation3 + $0x1], 0 }
   0x2   :  { %13 = vsyncpa [#allocation6], 0 }
   0x3   :  { %14 = vsyncpa [#allocation9], 0 }
   0x4   :  { %15 = vsyncpa [#allocation4], 0 }
   0x5   :  { %17 = vsyncpa [#allocation4 + $0x1], 0  ;;  %s2114_s18 = smov 0   ;;  %s2116_s19 = smov 0  }
   0x6   :  { %s2118_s20 = smov 0   ;;  %s2120_s21 = smov 0  }
   0x7 LB: > { %s2135_s22 = sadd.s32 4294967295, %s2073_s21   ;;  %s1194_s23 = sadd.s32 4294967294, %s2073_s21   ;;  %s2073_s21 = sphi %s2120_s21, %s2750_s21   ;;  %s2069_s20 = sphi %s2118_s20, %s2749_s20   ;;  %s2065_s19 = sphi %s2116_s19, %s2748_s19   ;;  %s2061_s18 = sphi %s2114_s18, %s2747_s18  }
   0x8   : > { %p43_p0 = scmp.ne.s32.totalorder %s2065_s19, %s2061_s18  ;;  %p2713_p1 = scmp.eq.s32.totalorder %s2135_s22, 0 }
   0x9   : > { %p157_p3 = scmp.eq.s32.totalorder %s1194_s23, 1  ;;  %p1195_p5 = scmp.ge.s32.totalorder %s2073_s21, 1 }
   0xa   : > { %p2144_p4 = por %p2713_p1, %p43_p0  ;;  %p164_p7 = scmp.lt.s32.totalorder %s2073_s21, 3 }
   0xb   : > { %p2149_p6 = por %p157_p3, %p43_p0  ;;  %s2075_s27 = smov [#allocation5]  }
   0xc   : > { %s2721_s24 = scalar_select %p2144_p4, 1, 0 }
   0xd   : > { %s2722_s25 = scalar_select %p2149_p6, 1, 0 }
   0xe   : > { %p2154_p8 = pnand %p1195_p5, %p164_p7  ;;  %s176_s28 = sshll.u32 %s2075_s27, 4  ;;  %s2158_s28 = int_to_ptr.vmem [resolvable:$true] %s176_s28 }
   0xf   : > { %s2076_s30 = smov [#allocation7]   ;;  %s1885_s9 = scalar_lea.hbm %s2708_s1, 8192 }
  0x10   : > { %s2723_s26 = scalar_select %p2154_p8, 1, 0 }
  0x11   : > { %p1819_p9 = pneg %p2154_p8  ;;  %s189_s6 = sshll.u32 %s2076_s30, 4  ;;  %s2169_s6 = int_to_ptr.vmem [resolvable:$true] %s189_s6 }
  0x12   : > { %p1886_p12 = scmp.ne.s32.totalorder %s2708_s1, %s1885_s9  ;;  %p1892_p5 = scmp.lt.u32.totalorder %s1885_s9, %s2708_s1 }
  0x13   : > { %p2165_p11 = pnand %p1819_p9, %p2713_p1 }
  0x15   : > { %p2179_p13 = pneg %p2165_p11 }
  0x17   : > { %p1888_p0 = pnand %p2179_p13, %p1886_p12 }
  0x19   : > { %p1889_p3 = pneg %p1888_p0 }
  0x1b   : > { %p1894_p7 = pnand %p1892_p5, %p1889_p3 }
  0x1d   : > { %1897 = shalt.err (!%p1894_p7)
}
  0x1e   : > { %s1898_s15 = scalar_lea.vmem %s2158_s28, 8192  ;;  %p1906_p2 = scmp.lt.s32.totalorder %s2158_s28, %s2158_s28 }
  0x1f   : > { %p1899_p9 = scmp.ne.s32.totalorder %s2158_s28, %s1898_s15  ;;  %p1907_p6 = scmp.lt.s32.totalorder %s1898_s15, %s1898_s15 }
  0x21   : > { %p1901_p10 = pnand %p1899_p9, %p2179_p13  ;;  %p1908_p12 = por %p1907_p6, %p1906_p2 }
  0x23   : > { %p1902_p1 = pneg %p1901_p10 }
  0x25   : > { %p1909_p0 = pnand %p1908_p12, %p1902_p1 }
  0x27   : > { %1912 = shalt.err (!%p1909_p0)
}
  0x28   : > { %s2077_s16 = smov 256   ;;  %s2078_s17 = smov 16  }
  0x29   : > { %1822 = dma.hbm_to_vmem [thread:$0]  (!%p2165_p11), %s2708_s1, 8192, %s2158_s28, [#allocation6], %s2077_s16, %s2077_s16, %s2078_s17  }
  0x2a   : > { %s1913_s8 = scalar_lea.hbm %s2709_s2, 4096 }
  0x2b   : > { %p1914_p2 = scmp.ne.s32.totalorder %s2709_s2, %s1913_s8  ;;  %p1920_p10 = scmp.lt.u32.totalorder %s1913_s8, %s2709_s2 }
  0x2d   : > { %p1916_p1 = pnand %p1914_p2, %p2179_p13 }
  0x2f   : > { %p1917_p6 = pneg %p1916_p1 }
  0x31   : > { %p1922_p3 = pnand %p1920_p10, %p1917_p6 }
  0x33   : > { %1925 = shalt.err (!%p1922_p3)
}
  0x34   : > { %s1926_s28 = scalar_lea.vmem %s2169_s6, 4096  ;;  %p1934_p12 = scmp.lt.s32.totalorder %s2169_s6, %s2169_s6 }
  0x35   : > { %p1927_p5 = scmp.ne.s32.totalorder %s2169_s6, %s1926_s28  ;;  %p1935_p0 = scmp.lt.s32.totalorder %s1926_s28, %s1926_s28 }
  0x37   : > { %p1929_p7 = pnand %p1927_p5, %p2179_p13  ;;  %p1936_p2 = por %p1935_p0, %p1934_p12 }
  0x39   : > { %p1930_p9 = pneg %p1929_p7 }
  0x3b   : > { %p1937_p1 = pnand %p1936_p2, %p1930_p9 }
  0x3d   : > { %1940 = shalt.err (!%p1937_p1)
}
  0x3e   : > { %s2079_s14 = smov 128   ;;  %s2080_s15 = smov 8  }
  0x3f   : > { %1825 = dma.hbm_to_vmem [thread:$0]  (!%p2165_p11), %s2709_s2, 4096, %s2169_s6, [#allocation6], %s2079_s14, %s2079_s14, %s2080_s15  }
  0x40   : > { %s2081_s23 = smov [#allocation8]   ;;  %s2224_s30 = sadd.s32 1, %s2073_s21  }
  0x41   : > { %s202_s27 = sshll.u32 %s2081_s23, 4  ;;  %s1941_s9 = scalar_lea.hbm %s2710_s3, 384  ;;  %s203_s27 = int_to_ptr.vmem [resolvable:$true] %s202_s27 }
  0x42   : > { %p1942_p6 = scmp.ne.s32.totalorder %s2710_s3, %s1941_s9  ;;  %p1948_p5 = scmp.lt.u32.totalorder %s1941_s9, %s2710_s3 }
  0x44   : > { %p1944_p10 = pnand %p1942_p6, %p2179_p13 }
  0x46   : > { %p1945_p3 = pneg %p1944_p10 }
  0x48   : > { %p1950_p7 = pnand %p1948_p5, %p1945_p3 }
  0x4a   : > { %1953 = shalt.err (!%p1950_p7)
}
  0x4b   : > { %s1954_s6 = scalar_lea.vmem %s203_s27, 384  ;;  %p1962_p2 = scmp.lt.s32.totalorder %s203_s27, %s203_s27 }
  0x4c   : > { %p1955_p9 = scmp.ne.s32.totalorder %s203_s27, %s1954_s6  ;;  %p1963_p1 = scmp.lt.s32.totalorder %s1954_s6, %s1954_s6 }
  0x4e   : > { %p1957_p12 = pnand %p1955_p9, %p2179_p13  ;;  %p1964_p4 = por %p1963_p1, %p1962_p2 }
  0x50   : > { %p1958_p0 = pneg %p1957_p12 }
  0x52   : > { %p1965_p8 = pnand %p1964_p4, %p1958_p0 }
  0x54   : > { %1968 = shalt.err (!%p1965_p8)
}
  0x55   : > { %1828 = dma.hbm_to_vmem [thread:$0]  (!%p2165_p11), %s2710_s3, 384, %s203_s27, [#allocation9], %s2079_s14, %s2079_s14, %s2080_s15  }
  0x56   : > { %s27_s12 = ssub.s32 %s2073_s21, %s2224_s30  ;;  %s30_s23 = sadd.s32 1, %s2069_s20 }
  0x57   : > { %p28_p4 = scmp.eq.s32.totalorder %s27_s12, 0  ;;  %p37_p8 = scmp.ne.s32.totalorder %s2069_s20, %s2065_s19 }
  0x58   : > { %p38_p13 = scmp.eq.s32.totalorder %s2073_s21, 0  ;;  %p1840_p6 = scmp.lt.s32.totalorder %s2073_s21, 2 }
  0x59   : > { %s2252_s29 = scalar_select %p28_p4, %s2069_s20, %s30_s23  }
  0x5a   : > { %p39_p10 = por %p38_p13, %p37_p8  ;;  %p2726_p3 = scmp.eq.s32.totalorder %s2135_s22, 1 }
  0x5b   : > { %s219_s8 = sand.u32 1, %s2069_s20   ;;  %s1211_s9 = sshll.u32 %s2073_s21, 7 }
  0x5c   : > { %p2256_p5 = por %p2726_p3, %p37_p8  ;;  %s1200_s10 = sshll.u32 %s219_s8, 3 }
  0x5d   : > { %s2265_s14 = scalar_lea.hbm %s2707_s0, %s1211_s9  ;;  %s223_s15 = scalar_lea.vmem [#allocation2], %s1200_s10 }
  0x5e   : > { %s231_s27 = sshll.u32 %s223_s15, 4  ;;  %p2267_p11 = pnand %p1840_p6, %p39_p10  ;;  %s2271_s27 = int_to_ptr.vmem [resolvable:$true] %s231_s27 }
  0x5f   : > { %s220_s6 = scalar_lea.sflag [#allocation3], %s219_s8  ;;  %s1969_s16 = scalar_lea.hbm %s2265_s14, 128 }
  0x60   : > { %p1970_p7 = scmp.ne.s32.totalorder %s2265_s14, %s1969_s16  ;;  %p1971_p9 = pneg %p2267_p11 }
  0x61   : > { %s1974_s23 = scalar_lea.hbm %s2707_s0, 256  ;;  %p1975_p2 = scmp.lt.u32.totalorder %s2265_s14, %s2707_s0 }
  0x62   : > { %p1972_p12 = pnand %p1971_p9, %p1970_p7  ;;  %p1976_p1 = scmp.lt.u32.totalorder %s1974_s23, %s1969_s16 }
  0x63   : > { %p1978_p8 = scmp.lt.u32.totalorder %s1969_s16, %s2265_s14 }
  0x64   : > { %p1973_p0 = pneg %p1972_p12  ;;  %p1977_p4 = por %p1976_p1, %p1975_p2 }
  0x66   : > { %p1979_p13 = por %p1978_p8, %p1977_p4 }
  0x68   : > { %p1980_p6 = pnand %p1979_p13, %p1973_p0 }
  0x6a   : > { %1983 = shalt.err (!%p1980_p6)
}
  0x6b   : > { %s1984_s8 = scalar_lea.vmem %s2271_s27, 128  ;;  %s2082_s11 = smov [#allocation2]  }
  0x6c   : > { %p1985_p10 = scmp.ne.s32.totalorder %s2271_s27, %s1984_s8  ;;  %s1989_s13 = sshll.u32 %s2082_s11, 4  ;;  %s1990_s13 = int_to_ptr.vmem [resolvable:$false] %s1989_s13 }
  0x6d   : > { %s1991_s15 = scalar_lea.vmem %s1990_s13, 256  ;;  %p1992_p12 = scmp.lt.s32.totalorder %s2271_s27, %s1990_s13 }
  0x6e   : > { %p1987_p3 = pnand %p1985_p10, %p1971_p9  ;;  %p1993_p2 = scmp.lt.s32.totalorder %s1991_s15, %s1984_s8 }
  0x70   : > { %p1988_p7 = pneg %p1987_p3  ;;  %p1994_p1 = por %p1993_p2, %p1992_p12 }
  0x72   : > { %p1995_p4 = pnand %p1994_p1, %p1988_p7 }
  0x74   : > { %1998 = shalt.err (!%p1995_p4)
}
  0x75   : > { %1832 = dma.hbm_to_vmem [thread:$0]  (!%p2267_p11), %s2265_s14, 128, %s2271_s27, %s220_s6  }
  0x76   : > { %p2729_p0 = scmp.ne.s32.totalorder %s2723_s26, 0 }
  0x78   : > { %240 = sbr.rel (%p2729_p0) target bundleno = 1545 (0x609), region = 40 }
  0x7f   : > { %s2301_s16 = sand.u32 1, %s2065_s19   ;;  %p2730_p9 = scmp.ne.s32.totalorder %s2721_s24, 0 }
  0x80   : > { %s1204_s17 = sshll.u32 %s2301_s16, 3  ;;  %s243_s12 = scalar_lea.sflag [#allocation3], %s2301_s16 }
  0x81   : > { %s2305_s23 = scalar_lea.vmem [#allocation2], %s1204_s17 }
  0x82   : > { %2044 = dma.done.wait (%p2730_p9), %s243_s12, 128  }
  0x83   : > { %2046 = vsyncadd (%p2730_p9), %s243_s12, 4294967168  ;;  %p2731_p11 = scmp.eq.s32.totalorder %s2135_s22, 0 }
  0x85   : > { %2048 = dma.done.wait (%p2731_p11), [#allocation6], 12288   ;;  %p2732_p8 = pmov %p2731_p11 }
  0x87   : > { %2050 = vsyncadd (%p2732_p8), [#allocation6], 4294955008  ;;  %p2733_p13 = pmov %p2732_p8 }
  0x88   : > { %p2734_p6 = pmov %p2732_p8 }
  0x89   : > { %2052 = dma.done.wait (%p2733_p13), [#allocation9], 384  }
  0x8a   : > { %2054 = vsyncadd (%p2734_p6), [#allocation9], 4294966912  ;;  %v286_v0 = vld [vmem:[#allocation5 + $0x8] sm:$0xff]  ;;  %v288_v1 = vld [vmem:[#allocation5 + $0x18] sm:$0xff]  ;;  %vm535_vm0 = vcmask 1043456   ;;  %s1208_s14 = sshll.u32 %s2135_s22, 4 }
  0x8b   : > { %v285_v2 = vld [vmem:[#allocation5] sm:$0xff]  ;;  %v2319_v3 = vpack.c.bf16 %v288_v1, %v286_v0  ;;  %v287_v4 = vld [vmem:[#allocation5 + $0x10] sm:$0xff]  ;;  %v290_v5 = vld [vmem:[#allocation5 + $0x28] sm:$0xff]  ;;  %s283_s27 = scalar_lea.vmem [#allocation10], %s2301_s16  ;;  %s2663_s10 = scalar_lea.hbm %s2712_s5, %s1208_s14 }
  0x8c   : > { %v292_v6 = vld [vmem:[#allocation5 + $0x38] sm:$0xff]  ;;  %v2321_v7 = vpack.c.bf16 %v287_v4, %v285_v2  ;;  %v289_v9 = vld [vmem:[#allocation5 + $0x20] sm:$0xff]  ;;  %v291_v10 = vld [vmem:[#allocation5 + $0x30] sm:$0xff]  ;;  %s1099_s28 = sshll.u32 %s283_s27, 4  ;;  %s1087_s8 = scalar_lea.sflag [#allocation4], %s2301_s16  ;;  %s2665_s28 = int_to_ptr.vmem [resolvable:$true] %s1099_s28 }
  0x8d   : > { %v2323_v8 = vpack.c.bf16 %v292_v6, %v290_v5  ;;  %v294_v11 = vld [vmem:[#allocation5 + $0x48] sm:$0xff]  ;;  %1388 = vmatprep.subr.bf16.mxu0 %v2319_v3  ;;  %v296_v12 = vld [vmem:[#allocation5 + $0x58] sm:$0xff]  ;;  %v2327_v13 = vpack.c.bf16 %v291_v10, %v289_v9  ;;  %v293_v15 = vld [vmem:[#allocation5 + $0x40] sm:$0xff]  ;;  %s1999_s11 = scalar_lea.vmem %s2665_s28, 16  ;;  %s2083_s22 = smov [#allocation10]  }
  0x8e   : > { %1390 = vmatpush1.bf16.msra.mxu0 %v2321_v7  ;;  %v2330_v14 = vpack.c.bf16 %v296_v12, %v294_v11  ;;  %v295_v16 = vld [vmem:[#allocation5 + $0x50] sm:$0xff]  ;;  %v298_v17 = vld [vmem:[#allocation5 + $0x68] sm:$0xff]  ;;  %v300_v18 = vld [vmem:[#allocation5 + $0x78] sm:$0xff]  ;;  %p2000_p10 = scmp.ne.s32.totalorder %s2665_s28, %s1999_s11  ;;  %s2003_s13 = sshll.u32 %s2083_s22, 4  ;;  %s2004_s13 = int_to_ptr.vmem [resolvable:$false] %s2003_s13 }
  0x8f   : > { %1392 = vmatprep.subr.bf16.mxu0 %v2323_v8  ;;  %v2333_v19 = vpack.c.bf16 %v295_v16, %v293_v15  ;;  %v2336_v20 = vpack.c.bf16 %v300_v18, %v298_v17  ;;  %v297_v21 = vld [vmem:[#allocation5 + $0x60] sm:$0xff]  ;;  %v299_v22 = vld [vmem:[#allocation5 + $0x70] sm:$0xff]  ;;  %v302_v23 = vld [vmem:[#allocation5 + $0x88] sm:$0xff]  ;;  %s2005_s15 = scalar_lea.vmem %s2004_s13, 32  ;;  %p2006_p12 = scmp.lt.s32.totalorder %s2665_s28, %s2004_s13 }
  0x90   : > { %v304_v24 = vld [vmem:[#allocation5 + $0x98] sm:$0xff]  ;;  %v2339_v25 = vpack.c.bf16 %v299_v22, %v297_v21  ;;  %v301_v27 = vld [vmem:[#allocation5 + $0x80] sm:$0xff]  ;;  %v303_v28 = vld [vmem:[#allocation5 + $0x90] sm:$0xff]  ;;  %p2001_p3 = pnand %p2000_p10, %p2256_p5  ;;  %p2007_p2 = scmp.lt.s32.totalorder %s2005_s15, %s1999_s11 }
  0x91   : > { %v2342_v26 = vpack.c.bf16 %v304_v24, %v302_v23  ;;  %v306_v29 = vld [vmem:[#allocation5 + $0xa8] sm:$0xff]  ;;  %v308_v30 = vld [vmem:[#allocation5 + $0xb8] sm:$0xff]  ;;  %v2345_v31 = vpack.c.bf16 %v303_v28, %v301_v27  ;;  %v305_v33 = vld [vmem:[#allocation5 + $0xa0] sm:$0xff] }
  0x92   : > { %1394 = vmatpush1.bf16.msra.mxu0 %v2327_v13  ;;  %v2348_v32 = vpack.c.bf16 %v308_v30, %v306_v29  ;;  %v307_v34 = vld [vmem:[#allocation5 + $0xb0] sm:$0xff]  ;;  %v310_v35 = vld [vmem:[#allocation5 + $0xc8] sm:$0xff]  ;;  %v312_v36 = vld [vmem:[#allocation5 + $0xd8] sm:$0xff]  ;;  %p2002_p7 = pneg %p2001_p3  ;;  %p2008_p1 = por %p2007_p2, %p2006_p12 }
  0x93   : > { %1396 = vmatprep.subr.bf16.mxu0 %v2330_v14  ;;  %v2351_v37 = vpack.c.bf16 %v307_v34, %v305_v33  ;;  %v309_v38 = vld [vmem:[#allocation5 + $0xc0] sm:$0xff]  ;;  %v311_v39 = vld [vmem:[#allocation5 + $0xd0] sm:$0xff]  ;;  %v314_v40 = vld [vmem:[#allocation5 + $0xe8] sm:$0xff]  ;;  %v2354_v41 = vpack.c.bf16 %v312_v36, %v310_v35 }
  0x94   : > { %v316_v42 = vld [vmem:[#allocation5 + $0xf8] sm:$0xff]  ;;  %v365_v44 = vld [vmem:[#allocation7 + $0x80] sm:$0xff]  ;;  %v366_v46 = vld [vmem:[#allocation7 + $0x88] sm:$0xff]  ;;  %v2366_v54 = vpack.c.bf16 %v311_v39, %v309_v38  ;;  %p2009_p4 = pnand %p2008_p1, %p2002_p7 }
  0x95   : > { %v2357_v43 = vld [vmem:[%s2305_s23] sm:$0xff]  ;;  %v349_v47 = vld [vmem:[#allocation7] sm:$0xff]  ;;  %v350_v48 = vld [vmem:[#allocation7 + $0x8] sm:$0xff]  ;;  %v2361_v49 = vpack.c.bf16 %v366_v46, %v365_v44  ;;  %v2371_v59 = vpack.c.bf16 %v316_v42, %v314_v40 }
  0x96   : > { %1398 = vmatpush1.bf16.msra.mxu0 %v2333_v19  ;;  %v382_v45 = vcombine.high %v2357_v43, %v2357_v43  ;;  %v2363_v50 = vpack.c.bf16 %v350_v48, %v349_v47  ;;  %v367_v51 = vld [vmem:[#allocation7 + $0x90] sm:$0xff]  ;;  %v368_v52 = vld [vmem:[#allocation7 + $0x98] sm:$0xff]  ;;  %v369_v57 = vld [vmem:[#allocation7 + $0xa0] sm:$0xff] }
  0x97   : > { %1400 = vmatprep.subr.bf16.mxu0 %v2336_v20  ;;  %v351_v53 = vld [vmem:[#allocation7 + $0x10] sm:$0xff]  ;;  %v2368_v55 = vpack.c.bf16 %v368_v52, %v367_v51  ;;  %v352_v56 = vld [vmem:[#allocation7 + $0x18] sm:$0xff]  ;;  %v370_v58 = vld [vmem:[#allocation7 + $0xa8] sm:$0xff]  ;;  %1452 = vmatprep.subr.bf16.mxu1 %v2361_v49 }
  0x98   : > { %448 = vmatprep.mubr.f32.mxu0 %v382_v45  ;;  %v313_v60 = vld [vmem:[#allocation5 + $0xe0] sm:$0xff]  ;;  %v315_v61 = vld [vmem:[#allocation5 + $0xf0] sm:$0xff]  ;;  %v318_v62 = vld [vmem:[#allocation5 + $0x108] sm:$0xff]  ;;  %1454 = vmatpush3.bf16.msra.mxu1 %v2363_v50  ;;  %v2375_v0 = vpack.c.bf16 %v352_v56, %v351_v53  ;;  %v2378_v1 = vpack.c.bf16 %v370_v58, %v369_v57 }
  0x99   : > { %v320_v63 = vld [vmem:[#allocation5 + $0x118] sm:$0xff]  ;;  %1456 = vmatprep.subr.bf16.mxu1 %v2368_v55  ;;  %v353_v2 = vld [vmem:[#allocation7 + $0x20] sm:$0xff]  ;;  %v354_v4 = vld [vmem:[#allocation7 + $0x28] sm:$0xff]  ;;  %v2381_v5 = vpack.c.bf16 %v315_v61, %v313_v60 }
  0x9a   : > { %1402 = vmatpush1.bf16.msra.mxu0 %v2339_v25  ;;  %v371_v6 = vld [vmem:[#allocation7 + $0xb0] sm:$0xff]  ;;  %v372_v9 = vld [vmem:[#allocation7 + $0xb8] sm:$0xff]  ;;  %v2384_v10 = vpack.c.bf16 %v320_v63, %v318_v62  ;;  %v317_v11 = vld [vmem:[#allocation5 + $0x100] sm:$0xff]  ;;  %v2387_v17 = vpack.c.bf16 %v354_v4, %v353_v2 }
  0x9b   : > { %1404 = vmatprep.subr.bf16.mxu0 %v2342_v26  ;;  %v319_v12 = vld [vmem:[#allocation5 + $0x110] sm:$0xff]  ;;  %v322_v15 = vld [vmem:[#allocation5 + $0x128] sm:$0xff]  ;;  %v324_v16 = vld [vmem:[#allocation5 + $0x138] sm:$0xff]  ;;  %v2390_v18 = vpack.c.bf16 %v372_v9, %v371_v6 }
  0x9c   : > { %1458 = vmatpush3.bf16.msra.mxu1 %v2375_v0  ;;  %v355_v21 = vld [vmem:[#allocation7 + $0x30] sm:$0xff]  ;;  %v356_v22 = vld [vmem:[#allocation7 + $0x38] sm:$0xff]  ;;  %v2393_v23 = vpack.c.bf16 %v319_v12, %v317_v11  ;;  %v373_v24 = vld [vmem:[#allocation7 + $0xc0] sm:$0xff]  ;;  %v2396_v28 = vpack.c.bf16 %v324_v16, %v322_v15 }
  0x9d   : > { %1460 = vmatprep.subr.bf16.mxu1 %v2378_v1  ;;  %v374_v27 = vld [vmem:[#allocation7 + $0xc8] sm:$0xff]  ;;  %v321_v29 = vld [vmem:[#allocation5 + $0x120] sm:$0xff]  ;;  %v323_v30 = vld [vmem:[#allocation5 + $0x130] sm:$0xff]  ;;  %v2399_v35 = vpack.c.bf16 %v356_v22, %v355_v21 }
  0x9e   : > { %1406 = vmatpush1.bf16.msra.mxu0 %v2345_v31  ;;  %v326_v33 = vld [vmem:[#allocation5 + $0x148] sm:$0xff]  ;;  %v328_v34 = vld [vmem:[#allocation5 + $0x158] sm:$0xff]  ;;  %v2402_v36 = vpack.c.bf16 %v374_v27, %v373_v24  ;;  %v357_v38 = vld [vmem:[#allocation7 + $0x40] sm:$0xff]  ;;  %v2405_v40 = vpack.c.bf16 %v323_v30, %v321_v29 }
  0x9f   : > { %1408 = vmatprep.subr.bf16.mxu0 %v2348_v32  ;;  %v358_v39 = vld [vmem:[#allocation7 + $0x48] sm:$0xff]  ;;  %v375_v42 = vld [vmem:[#allocation7 + $0xd0] sm:$0xff]  ;;  %v376_v44 = vld [vmem:[#allocation7 + $0xd8] sm:$0xff]  ;;  %v2408_v45 = vpack.c.bf16 %v328_v34, %v326_v33 }
  0xa0   : > { %1462 = vmatpush3.bf16.msra.mxu1 %v2387_v17  ;;  %v325_v46 = vld [vmem:[#allocation5 + $0x140] sm:$0xff]  ;;  %v327_v47 = vld [vmem:[#allocation5 + $0x150] sm:$0xff]  ;;  %v330_v48 = vld [vmem:[#allocation5 + $0x168] sm:$0xff]  ;;  %v2411_v52 = vpack.c.bf16 %v358_v39, %v357_v38  ;;  %v2414_v53 = vpack.c.bf16 %v376_v44, %v375_v42 }
  0xa1   : > { %1464 = vmatprep.subr.bf16.mxu1 %v2390_v18  ;;  %v332_v51 = vld [vmem:[#allocation5 + $0x178] sm:$0xff]  ;;  %v359_v56 = vld [vmem:[#allocation7 + $0x50] sm:$0xff]  ;;  %v2417_v58 = vpack.c.bf16 %v327_v47, %v325_v46  ;;  %v329_v61 = vld [vmem:[#allocation5 + $0x160] sm:$0xff] }
  0xa2   : > { %1410 = vmatpush1.bf16.msra.mxu0 %v2351_v37  ;;  %v360_v57 = vld [vmem:[#allocation7 + $0x58] sm:$0xff]  ;;  %v2420_v60 = vpack.c.bf16 %v332_v51, %v330_v48  ;;  %v331_v62 = vld [vmem:[#allocation5 + $0x170] sm:$0xff]  ;;  %v334_v63 = vld [vmem:[#allocation5 + $0x188] sm:$0xff] }
  0xa3   : > { %1412 = vmatprep.subr.bf16.mxu0 %v2354_v41  ;;  %v336_v2 = vld [vmem:[#allocation5 + $0x198] sm:$0xff]  ;;  %v2423_v4 = vpack.c.bf16 %v360_v57, %v359_v56  ;;  %v2427_v6 = vpack.c.bf16 %v331_v62, %v329_v61  ;;  %v333_v11 = vld [vmem:[#allocation5 + $0x180] sm:$0xff]  ;;  %v335_v12 = vld [vmem:[#allocation5 + $0x190] sm:$0xff] }
  0xa4   : > { %1466 = vmatpush3.bf16.msra.mxu1 %v2399_v35  ;;  %v2430_v9 = vpack.c.bf16 %v336_v2, %v334_v63  ;;  %v338_v15 = vld [vmem:[#allocation5 + $0x1a8] sm:$0xff]  ;;  %v340_v16 = vld [vmem:[#allocation5 + $0x1b8] sm:$0xff]  ;;  %v2434_v21 = vpack.c.bf16 %v335_v12, %v333_v11  ;;  %v337_v24 = vld [vmem:[#allocation5 + $0x1a0] sm:$0xff] }
  0xa5   : > { %1468 = vmatprep.subr.bf16.mxu1 %v2402_v36  ;;  %2735 = vst [vmem:[#allocation15_spill] sm:$0xff] %v2423_v4  ;;  %v2437_v22 = vpack.c.bf16 %v340_v16, %v338_v15  ;;  %v339_v27 = vld [vmem:[#allocation5 + $0x1b0] sm:$0xff]  ;;  %v342_v29 = vld [vmem:[#allocation5 + $0x1c8] sm:$0xff]  ;;  %v344_v30 = vld [vmem:[#allocation5 + $0x1d8] sm:$0xff] }
  0xa6   : > { %1414 = vmatpush1.bf16.msra.mxu0 %v2366_v54  ;;  %v2440_v33 = vpack.c.bf16 %v339_v27, %v337_v24  ;;  %v2443_v34 = vpack.c.bf16 %v344_v30, %v342_v29  ;;  %v341_v38 = vld [vmem:[#allocation5 + $0x1c0] sm:$0xff]  ;;  %v343_v39 = vld [vmem:[#allocation5 + $0x1d0] sm:$0xff]  ;;  %v346_v42 = vld [vmem:[#allocation5 + $0x1e8] sm:$0xff] }
  0xa7   : > { %1416 = vmatprep.subr.bf16.mxu0 %v2371_v59  ;;  %v348_v44 = vld [vmem:[#allocation5 + $0x1f8] sm:$0xff]  ;;  %v2446_v46 = vpack.c.bf16 %v343_v39, %v341_v38  ;;  %v345_v48 = vld [vmem:[#allocation5 + $0x1e0] sm:$0xff]  ;;  %v347_v51 = vld [vmem:[#allocation5 + $0x1f0] sm:$0xff] }
  0xa8   : > { %1470 = vmatpush3.bf16.msra.mxu1 %v2411_v52  ;;  %v2449_v47 = vpack.c.bf16 %v348_v44, %v346_v42  ;;  %v2452_v56 = vpack.c.bf16 %v347_v51, %v345_v48  ;;  %v377_v57 = vld [vmem:[#allocation7 + $0xe0] sm:$0xff]  ;;  %v378_v61 = vld [vmem:[#allocation7 + $0xe8] sm:$0xff]  ;;  %v379_v12 = vld [vmem:[#allocation7 + $0xf0] sm:$0xff] }
  0xa9   : > { %1472 = vmatprep.subr.bf16.mxu1 %v2414_v53  ;;  %v2469_v62 = vpack.c.bf16 %v378_v61, %v377_v57  ;;  %v361_v63 = vld [vmem:[#allocation7 + $0x60] sm:$0xff]  ;;  %v362_v2 = vld [vmem:[#allocation7 + $0x68] sm:$0xff]  ;;  %v380_v15 = vld [vmem:[#allocation7 + $0xf8] sm:$0xff] }
  0xaa   : > { %1418 = vmatpush1.bf16.msra.mxu0 %v2381_v5  ;;  %v2471_v11 = vpack.c.bf16 %v362_v2, %v361_v63  ;;  %v2477_v16 = vpack.c.bf16 %v380_v15, %v379_v12  ;;  %v363_v24 = vld [vmem:[#allocation7 + $0x70] sm:$0xff]  ;;  %v364_v27 = vld [vmem:[#allocation7 + $0x78] sm:$0xff] }
  0xab   : > { %1420 = vmatprep.subr.bf16.mxu0 %v2384_v10  ;;  %2736 = vst [vmem:[#allocation16_spill] sm:$0xff] %v2469_v62  ;;  %v2479_v29 = vpack.c.bf16 %v364_v27, %v363_v24 }
  0xac   : > { %1474 = vmatpush3.bf16.msra.mxu1 %v2423_v4  ;;  %2737 = vst [vmem:[#allocation17_spill] sm:$0xff] %v2471_v11  ;;  %2738 = vst [vmem:[#allocation18_spill] sm:$0xff] %v2477_v16 }
  0xad   : > { %1476 = vmatprep.subr.bf16.mxu1 %v2469_v62  ;;  %2739 = vst [vmem:[#allocation19_spill] sm:$0xff] %v2479_v29 }
  0xae   : > { %1422 = vmatpush1.bf16.msra.mxu0 %v2393_v23 }
  0xaf   : > { %1424 = vmatprep.subr.bf16.mxu0 %v2396_v28 }
  0xb0   : > { %1478 = vmatpush3.bf16.msra.mxu1 %v2471_v11 }
  0xb1   : > { %1480 = vmatprep.subr.bf16.mxu1 %v2477_v16 }
  0xb2   : > { %1426 = vmatpush1.bf16.msra.mxu0 %v2405_v40 }
  0xb3   : > { %1428 = vmatprep.subr.bf16.mxu0 %v2408_v45 }
  0xb4   : > { %1482 = vmatpush3.bf16.msra.mxu1 %v2479_v29 }
  0xb5   : > { %1484 = vmatprep.subr.bf16.mxu1 %v2319_v3 }
  0xb6   : > { %1430 = vmatpush1.bf16.msra.mxu0 %v2417_v58 }
  0xb7   : > { %1432 = vmatprep.subr.bf16.mxu0 %v2420_v60 }
  0xba   : > { %1434 = vmatpush1.bf16.msra.mxu0 %v2427_v6 }
  0xbb   : > { %1436 = vmatprep.subr.bf16.mxu0 %v2430_v9 }
  0xbe   : > { %1438 = vmatpush1.bf16.msra.mxu0 %v2434_v21 }
  0xbf   : > { %1440 = vmatprep.subr.bf16.mxu0 %v2437_v22 }
  0xc2   : > { %1442 = vmatpush1.bf16.msra.mxu0 %v2440_v33 }
  0xc3   : > { %1444 = vmatprep.subr.bf16.mxu0 %v2443_v34 }
  0xc6   : > { %1446 = vmatpush1.bf16.msra.mxu0 %v2446_v46 }
  0xc7   : > { %1448 = vmatprep.subr.bf16.mxu0 %v2449_v47 }
  0xca   : > { %1450 = vmatpush1.bf16.msra.mxu0 %v2452_v56 }
  0xcb   : > { %1548 = vmatprep.subr.bf16.mxu0 %v2361_v49 }
  0xcd   : > { %449 = vmatmul.mubr.f32.vlgmr.msra.gmra.mrb[0].mxu0 %v2357_v43 }
  0xce   : > { %1550 = vmatpush3.bf16.msra.mxu0 %v2363_v50 }
  0xcf   : > { %1552 = vmatprep.subr.bf16.mxu0 %v2368_v55 }
  0xd2   : > { %1554 = vmatpush3.bf16.msra.mxu0 %v2375_v0 }
  0xd3   : > { %1556 = vmatprep.subr.bf16.mxu0 %v2378_v1 }
  0xd6   : > { %1558 = vmatpush3.bf16.msra.mxu0 %v2387_v17 }
  0xd7   : > { %1560 = vmatprep.subr.bf16.mxu0 %v2390_v18 }
  0xda   : > { %1562 = vmatpush3.bf16.msra.mxu0 %v2399_v35 }
  0xdb   : > { %1564 = vmatprep.subr.bf16.mxu0 %v2402_v36 }
  0xde   : > { %1566 = vmatpush3.bf16.msra.mxu0 %v2411_v52 }
  0xdf   : > { %1568 = vmatprep.subr.bf16.mxu0 %v2414_v53 }
  0xe2   : > { %1570 = vmatpush3.bf16.msra.mxu0 %v2423_v4 }
  0xe3   : > { %1572 = vmatprep.subr.bf16.mxu0 %v2469_v62 }
  0xe6   : > { %1574 = vmatpush3.bf16.msra.mxu0 %v2471_v11 }
  0xe7   : > { %1576 = vmatprep.subr.bf16.mxu0 %v2477_v16 }
  0xea   : > { %1578 = vmatpush3.bf16.msra.mxu0 %v2479_v29 }
  0xeb   : > { %1580 = vmatprep.subr.bf16.mxu0 %v2319_v3 }
 0x1a0   : > { %v2487_v30 = vpop.f32.mrb[0].mxu0 }
 0x1a1   : > { %v2489_v38 = vpop.f32.mrb[1].mxu0 }
 0x1a2   : > { %v457_v39 = vcombine.low %v2487_v30, %v2489_v38 }
 0x1a4   : > { %v459_v42 = vsub.f32 %v2357_v43, %v457_v39  ;;  %v687_v39 = vld [vmem:[#allocation8 + $0x4] sm:$0xf] }
 0x1a6   : > { %v461_v44 = vcombine.high %v459_v42, %v459_v42 }
 0x1a8   : > { %527 = vmatprep.mubr.f32.mxu1 %v461_v44 }
 0x1a9   : > { %528 = vmatmul.mubr.f32.vlgmr.msra.gmra.mrb[0].mxu1 %v459_v42 }
 0x1aa   : > { %1486 = vmatpush1.bf16.msra.mxu1 %v2321_v7  ;;  %608 = vmatprep.mubr.f32.mxu1 %v2489_v38 }
 0x1ab   : > { %1488 = vmatprep.subr.bf16.mxu1 %v2323_v8 }
 0x1ae   : > { %1490 = vmatpush1.bf16.msra.mxu1 %v2327_v13 }
 0x1af   : > { %1492 = vmatprep.subr.bf16.mxu1 %v2330_v14 }
 0x1b2   : > { %1494 = vmatpush1.bf16.msra.mxu1 %v2333_v19 }
 0x1b3   : > { %1496 = vmatprep.subr.bf16.mxu1 %v2336_v20 }
 0x1b6   : > { %1498 = vmatpush1.bf16.msra.mxu1 %v2339_v25 }
 0x1b7   : > { %1500 = vmatprep.subr.bf16.mxu1 %v2342_v26 }
 0x1ba   : > { %1502 = vmatpush1.bf16.msra.mxu1 %v2345_v31 }
 0x1bb   : > { %1504 = vmatprep.subr.bf16.mxu1 %v2348_v32 }
 0x1be   : > { %1506 = vmatpush1.bf16.msra.mxu1 %v2351_v37 }
 0x1bf   : > { %1508 = vmatprep.subr.bf16.mxu1 %v2354_v41 }
 0x1c2   : > { %1510 = vmatpush1.bf16.msra.mxu1 %v2366_v54 }
 0x1c3   : > { %1512 = vmatprep.subr.bf16.mxu1 %v2371_v59 }
 0x1c6   : > { %1514 = vmatpush1.bf16.msra.mxu1 %v2381_v5 }
 0x1c7   : > { %1516 = vmatprep.subr.bf16.mxu1 %v2384_v10 }
 0x1ca   : > { %1518 = vmatpush1.bf16.msra.mxu1 %v2393_v23 }
 0x1cb   : > { %1520 = vmatprep.subr.bf16.mxu1 %v2396_v28 }
 0x1ce   : > { %1522 = vmatpush1.bf16.msra.mxu1 %v2405_v40 }
 0x1cf   : > { %1524 = vmatprep.subr.bf16.mxu1 %v2408_v45 }
 0x1d2   : > { %1526 = vmatpush1.bf16.msra.mxu1 %v2417_v58 }
 0x1d3   : > { %1528 = vmatprep.subr.bf16.mxu1 %v2420_v60 }
 0x1d6   : > { %1530 = vmatpush1.bf16.msra.mxu1 %v2427_v6 }
 0x1d7   : > { %1532 = vmatprep.subr.bf16.mxu1 %v2430_v9 }
 0x1da   : > { %1534 = vmatpush1.bf16.msra.mxu1 %v2434_v21 }
 0x1db   : > { %1536 = vmatprep.subr.bf16.mxu1 %v2437_v22 }
 0x1de   : > { %1538 = vmatpush1.bf16.msra.mxu1 %v2440_v33 }
 0x1df   : > { %1540 = vmatprep.subr.bf16.mxu1 %v2443_v34 }
 0x1e2   : > { %1542 = vmatpush1.bf16.msra.mxu1 %v2446_v46 }
 0x1e3   : > { %1544 = vmatprep.subr.bf16.mxu1 %v2449_v47 }
 0x1e6   : > { %1546 = vmatpush1.bf16.msra.mxu1 %v2452_v56 }
 0x1e7   : > { %1644 = vmatprep.subr.bf16.mxu1 %v2361_v49 }
 0x1e9   : > { %609 = vmatmul.mubr.f32.vlgmr.msra.gmra.mrb[2].mxu1 %v2487_v30 }
 0x1ea   : > { %1646 = vmatpush3.bf16.msra.mxu1 %v2363_v50 }
 0x1eb   : > { %1648 = vmatprep.subr.bf16.mxu1 %v2368_v55 }
 0x1ee   : > { %1650 = vmatpush3.bf16.msra.mxu1 %v2375_v0 }
 0x1ef   : > { %1652 = vmatprep.subr.bf16.mxu1 %v2378_v1 }
 0x1f2   : > { %1654 = vmatpush3.bf16.msra.mxu1 %v2387_v17 }
 0x1f3   : > { %1656 = vmatprep.subr.bf16.mxu1 %v2390_v18 }
 0x1f6   : > { %1658 = vmatpush3.bf16.msra.mxu1 %v2399_v35 }
 0x1f7   : > { %1660 = vmatprep.subr.bf16.mxu1 %v2402_v36 }
 0x1fa   : > { %1662 = vmatpush3.bf16.msra.mxu1 %v2411_v52 }
 0x1fb   : > { %1664 = vmatprep.subr.bf16.mxu1 %v2414_v53 }
 0x1fe   : > { %1666 = vmatpush3.bf16.msra.mxu1 %v2423_v4 }
 0x1ff   : > { %1668 = vmatprep.subr.bf16.mxu1 %v2469_v62 }
 0x202   : > { %1670 = vmatpush3.bf16.msra.mxu1 %v2471_v11 }
 0x203   : > { %1672 = vmatprep.subr.bf16.mxu1 %v2477_v16 }
 0x206   : > { %1674 = vmatpush3.bf16.msra.mxu1 %v2479_v29 }
 0x207   : > { %1676 = vmatprep.subr.bf16.mxu1 %v2319_v3  ;;  %v533_v3 = vld [vmem:[#allocation8] sm:$0xf] }
 0x27c   : > { %v1244_v43 = vpop.f32.mrb[0].mxu1 }
 0x27d   : > { %v1245_v48 = vpop.f32.mrb[1].mxu1 }
 0x27e   : > { %v1246_v51 = vadd.f32 %v1245_v48, %v1244_v43 }
 0x280   : > { %v534_v12 = vmul.f32 %v1246_v51, %v533_v3 }
 0x282   : > { %v536_v15 = vsel %vm535_vm0, %v534_v12, 0.0 }
 0x283   : > { %v537_v24 = vrot.slane %v536_v15, 4 }
 0x2bc   : > { %v2544_v57 = vpop.f32.mrb[2].mxu1 }
 0x2bd   : > { %v615_v61 = vsub.f32 %v2487_v30, %v2544_v57  ;;  %v2548_v63 = vpop.f32.mrb[3].mxu1  ;;  %v538_v30 = vadd.f32 %v537_v24, %v536_v15 }
 0x2be   : > { %v616_v2 = vsub.f32 %v2489_v38, %v2548_v63 }
 0x2bf   : > { %v539_v43 = vrot.slane %v538_v30, 2 }
 0x2c0   : > { %681 = vmatprep.mubr.f32.mxu0 %v616_v2 }
 0x2c1   : > { %682 = vmatmul.mubr.f32.vlgmr.msra.gmra.mrb[2].mxu0 %v615_v61  ;;  %v540_v2 = vadd.f32 %v539_v43, %v538_v30 }
 0x2c2   : > { %1582 = vmatpush1.bf16.msra.mxu0 %v2321_v7  ;;  %761 = vmatprep.mubr.f32.mxu0 %v2548_v63 }
 0x2c3   : > { %1584 = vmatprep.subr.bf16.mxu0 %v2323_v8 }
 0x2c6   : > { %1586 = vmatpush1.bf16.msra.mxu0 %v2327_v13 }
 0x2c7   : > { %1588 = vmatprep.subr.bf16.mxu0 %v2330_v14 }
 0x2ca   : > { %1590 = vmatpush1.bf16.msra.mxu0 %v2333_v19 }
 0x2cb   : > { %1592 = vmatprep.subr.bf16.mxu0 %v2336_v20 }
 0x2ce   : > { %1594 = vmatpush1.bf16.msra.mxu0 %v2339_v25 }
 0x2cf   : > { %1596 = vmatprep.subr.bf16.mxu0 %v2342_v26 }
 0x2d2   : > { %1598 = vmatpush1.bf16.msra.mxu0 %v2345_v31 }
 0x2d3   : > { %1600 = vmatprep.subr.bf16.mxu0 %v2348_v32 }
 0x2d6   : > { %1602 = vmatpush1.bf16.msra.mxu0 %v2351_v37 }
 0x2d7   : > { %1604 = vmatprep.subr.bf16.mxu0 %v2354_v41 }
 0x2da   : > { %1606 = vmatpush1.bf16.msra.mxu0 %v2366_v54 }
 0x2db   : > { %1608 = vmatprep.subr.bf16.mxu0 %v2371_v59 }
 0x2de   : > { %1610 = vmatpush1.bf16.msra.mxu0 %v2381_v5 }
 0x2df   : > { %1612 = vmatprep.subr.bf16.mxu0 %v2384_v10 }
 0x2e2   : > { %1614 = vmatpush1.bf16.msra.mxu0 %v2393_v23 }
 0x2e3   : > { %1616 = vmatprep.subr.bf16.mxu0 %v2396_v28 }
 0x2e6   : > { %1618 = vmatpush1.bf16.msra.mxu0 %v2405_v40 }
 0x2e7   : > { %1620 = vmatprep.subr.bf16.mxu0 %v2408_v45 }
 0x2ea   : > { %1622 = vmatpush1.bf16.msra.mxu0 %v2417_v58 }
 0x2eb   : > { %1624 = vmatprep.subr.bf16.mxu0 %v2420_v60 }
 0x2ee   : > { %1626 = vmatpush1.bf16.msra.mxu0 %v2427_v6 }
 0x2ef   : > { %1628 = vmatprep.subr.bf16.mxu0 %v2430_v9 }
 0x2f2   : > { %1630 = vmatpush1.bf16.msra.mxu0 %v2434_v21 }
 0x2f3   : > { %1632 = vmatprep.subr.bf16.mxu0 %v2437_v22 }
 0x2f6   : > { %1634 = vmatpush1.bf16.msra.mxu0 %v2440_v33 }
 0x2f7   : > { %1636 = vmatprep.subr.bf16.mxu0 %v2443_v34 }
 0x2fa   : > { %1638 = vmatpush1.bf16.msra.mxu0 %v2446_v46 }
 0x2fb   : > { %1640 = vmatprep.subr.bf16.mxu0 %v2449_v47 }
 0x2fe   : > { %1642 = vmatpush1.bf16.msra.mxu0 %v2452_v56 }
 0x2ff   : > { %1740 = vmatprep.subr.bf16.mxu0 %v2361_v49 }
 0x301   : > { %762 = vmatmul.mubr.f32.vlgmr.msra.gmra.mrb[4].mxu0 %v2544_v57 }
 0x302   : > { %1742 = vmatpush3.bf16.msra.mxu0 %v2363_v50 }
 0x303   : > { %1744 = vmatprep.subr.bf16.mxu0 %v2368_v55 }
 0x306   : > { %1746 = vmatpush3.bf16.msra.mxu0 %v2375_v0 }
 0x307   : > { %1748 = vmatprep.subr.bf16.mxu0 %v2378_v1 }
 0x30a   : > { %1750 = vmatpush3.bf16.msra.mxu0 %v2387_v17 }
 0x30b   : > { %1752 = vmatprep.subr.bf16.mxu0 %v2390_v18 }
 0x30e   : > { %1754 = vmatpush3.bf16.msra.mxu0 %v2399_v35 }
 0x30f   : > { %1756 = vmatprep.subr.bf16.mxu0 %v2402_v36 }
 0x312   : > { %1758 = vmatpush3.bf16.msra.mxu0 %v2411_v52 }
 0x313   : > { %1760 = vmatprep.subr.bf16.mxu0 %v2414_v53 }
 0x316   : > { %1762 = vmatpush3.bf16.msra.mxu0 %v2423_v4 }
 0x317   : > { %1764 = vmatprep.subr.bf16.mxu0 %v2469_v62 }
 0x31a   : > { %1766 = vmatpush3.bf16.msra.mxu0 %v2471_v11 }
 0x31b   : > { %1768 = vmatprep.subr.bf16.mxu0 %v2477_v16 }
 0x31e   : > { %1770 = vmatpush3.bf16.msra.mxu0 %v2479_v29 }
 0x31f   : > { %1772 = vmatprep.subr.bf16.mxu0 %v2361_v49  ;;  %v541_v49 = vrot.slane %v540_v2, 1 }
 0x321   : > { %v542_v3 = vadd.f32 %v541_v49, %v540_v2 }
 0x394   : > { %v1279_v27 = vpop.f32.mrb[2].mxu0 }
 0x395   : > { %v1280_v38 = vpop.f32.mrb[3].mxu0 }
 0x396   : > { %v1281_v42 = vadd.f32 %v1280_v38, %v1279_v27 }
 0x398   : > { %v688_v44 = vmul.f32 %v1281_v42, %v687_v39 }
 0x39a   : > { %v689_v48 = vsel %vm535_vm0, %v688_v44, 0.0 }
 0x39b   : > { %v690_v61 = vrot.slane %v689_v48, 4 }
 0x39d   : > { %v691_v29 = vadd.f32 %v690_v61, %v689_v48 }
 0x39f   : > { %v692_v16 = vrot.slane %v691_v29, 2 }
 0x3a1   : > { %v693_v11 = vadd.f32 %v692_v16, %v691_v29 }
 0x3a3   : > { %v694_v51 = vrot.slane %v693_v11, 1 }
 0x3a5   : > { %v695_v62 = vadd.f32 %v694_v51, %v693_v11 }
 0x3a7   : > { %v696_v12 = vadd.f32 %v695_v62, %v542_v3 }
 0x3d4   : > { %v763_v4 = vpop.f32.mrb[4].mxu0 }
 0x3d5   : > { %v768_v15 = vsub.f32 %v2544_v57, %v763_v4  ;;  %v765_v24 = vpop.f32.mrb[5].mxu0 }
 0x3d6   : > { %v769_v27 = vsub.f32 %v2548_v63, %v765_v24  ;;  %v1083_v63 = vld [vmem:[%s2711_s4] sm:$0x1] }
 0x3d8   : > { %834 = vmatprep.mubr.f32.mxu1 %v769_v27 }
 0x3d9   : > { %835 = vmatmul.mubr.f32.vlgmr.msra.gmra.mrb[4].mxu1 %v768_v15 }
 0x3da   : > { %1678 = vmatpush1.bf16.msra.mxu1 %v2321_v7  ;;  %914 = vmatprep.mubr.f32.mxu1 %v765_v24 }
 0x3db   : > { %1680 = vmatprep.subr.bf16.mxu1 %v2323_v8 }
 0x3de   : > { %1682 = vmatpush1.bf16.msra.mxu1 %v2327_v13  ;;  %v840_v13 = vld [vmem:[#allocation8 + $0x8] sm:$0xf] }
 0x3df   : > { %1684 = vmatprep.subr.bf16.mxu1 %v2330_v14 }
 0x3e2   : > { %1686 = vmatpush1.bf16.msra.mxu1 %v2333_v19 }
 0x3e3   : > { %1688 = vmatprep.subr.bf16.mxu1 %v2336_v20 }
 0x3e6   : > { %1690 = vmatpush1.bf16.msra.mxu1 %v2339_v25 }
 0x3e7   : > { %1692 = vmatprep.subr.bf16.mxu1 %v2342_v26 }
 0x3ea   : > { %1694 = vmatpush1.bf16.msra.mxu1 %v2345_v31 }
 0x3eb   : > { %1696 = vmatprep.subr.bf16.mxu1 %v2348_v32 }
 0x3ee   : > { %1698 = vmatpush1.bf16.msra.mxu1 %v2351_v37 }
 0x3ef   : > { %1700 = vmatprep.subr.bf16.mxu1 %v2354_v41 }
 0x3f2   : > { %1702 = vmatpush1.bf16.msra.mxu1 %v2366_v54 }
 0x3f3   : > { %1704 = vmatprep.subr.bf16.mxu1 %v2371_v59 }
 0x3f6   : > { %1706 = vmatpush1.bf16.msra.mxu1 %v2381_v5 }
 0x3f7   : > { %1708 = vmatprep.subr.bf16.mxu1 %v2384_v10 }
 0x3fa   : > { %1710 = vmatpush1.bf16.msra.mxu1 %v2393_v23 }
 0x3fb   : > { %1712 = vmatprep.subr.bf16.mxu1 %v2396_v28  ;;  %v2741_v28 = vld [vmem:[#allocation16_spill] sm:$0xff] }
 0x3fe   : > { %1714 = vmatpush1.bf16.msra.mxu1 %v2405_v40 }
 0x3ff   : > { %1716 = vmatprep.subr.bf16.mxu1 %v2408_v45 }
 0x402   : > { %1718 = vmatpush1.bf16.msra.mxu1 %v2417_v58 }
 0x403   : > { %1720 = vmatprep.subr.bf16.mxu1 %v2420_v60 }
 0x406   : > { %1722 = vmatpush1.bf16.msra.mxu1 %v2427_v6 }
 0x407   : > { %1724 = vmatprep.subr.bf16.mxu1 %v2430_v9 }
 0x40a   : > { %1726 = vmatpush1.bf16.msra.mxu1 %v2434_v21 }
 0x40b   : > { %1728 = vmatprep.subr.bf16.mxu1 %v2437_v22 }
 0x40e   : > { %1730 = vmatpush1.bf16.msra.mxu1 %v2440_v33  ;;  %v1073_v33 = vld [vmem:[#allocation8 + $0x10] sm:$0xf] }
 0x40f   : > { %1732 = vmatprep.subr.bf16.mxu1 %v2443_v34 }
 0x412   : > { %1734 = vmatpush1.bf16.msra.mxu1 %v2446_v46 }
 0x413   : > { %1736 = vmatprep.subr.bf16.mxu1 %v2449_v47 }
 0x416   : > { %1738 = vmatpush1.bf16.msra.mxu1 %v2452_v56 }
 0x419   : > { %915 = vmatmul.mubr.f32.vlgmr.msra.gmra.mrb[6].mxu1 %v763_v4 }
 0x4ac   : > { %v1314_v7 = vpop.f32.mrb[4].mxu1 }
 0x4ad   : > { %v1315_v8 = vpop.f32.mrb[5].mxu1 }
 0x4ae   : > { %v1316_v14 = vadd.f32 %v1315_v8, %v1314_v7 }
 0x4b0   : > { %v841_v19 = vmul.f32 %v1316_v14, %v840_v13 }
 0x4b2   : > { %v842_v20 = vsel %vm535_vm0, %v841_v19, 0.0 }
 0x4b3   : > { %v843_v25 = vrot.slane %v842_v20, 4 }
 0x4b5   : > { %v844_v26 = vadd.f32 %v843_v25, %v842_v20 }
 0x4b7   : > { %v845_v31 = vrot.slane %v844_v26, 2 }
 0x4b9   : > { %v846_v32 = vadd.f32 %v845_v31, %v844_v26 }
 0x4bb   : > { %v847_v37 = vrot.slane %v846_v32, 1 }
 0x4bd   : > { %v848_v41 = vadd.f32 %v847_v37, %v846_v32 }
 0x4bf   : > { %v849_v54 = vadd.f32 %v848_v41, %v696_v12 }
 0x4ec   : > { %v916_v59 = vpop.f32.mrb[6].mxu1 }
 0x4ed   : > { %v921_v5 = vsub.f32 %v763_v4, %v916_v59  ;;  %v918_v10 = vpop.f32.mrb[7].mxu1 }
 0x4ee   : > { %v922_v23 = vsub.f32 %v765_v24, %v918_v10 }
 0x4f0   : > { %987 = vmatprep.mubr.f32.mxu0 %v922_v23 }
 0x4f1   : > { %988 = vmatmul.mubr.f32.vlgmr.msra.gmra.mrb[6].mxu0 %v921_v5 }
 0x4f2   : > { %1774 = vmatpush3.bf16.msra.mxu0 %v2363_v50  ;;  %1067 = vmatprep.mubr.f32.mxu0 %v918_v10  ;;  %v2740_v50 = vld [vmem:[#allocation15_spill] sm:$0xff] }
 0x4f3   : > { %1776 = vmatprep.subr.bf16.mxu0 %v2368_v55  ;;  %v2742_v55 = vld [vmem:[#allocation17_spill] sm:$0xff] }
 0x4f6   : > { %1778 = vmatpush3.bf16.msra.mxu0 %v2375_v0  ;;  %v2743_v0 = vld [vmem:[#allocation18_spill] sm:$0xff] }
 0x4f7   : > { %1780 = vmatprep.subr.bf16.mxu0 %v2378_v1  ;;  %v2744_v1 = vld [vmem:[#allocation19_spill] sm:$0xff] }
 0x4fa   : > { %1782 = vmatpush3.bf16.msra.mxu0 %v2387_v17 }
 0x4fb   : > { %1784 = vmatprep.subr.bf16.mxu0 %v2390_v18 }
 0x4fe   : > { %1786 = vmatpush3.bf16.msra.mxu0 %v2399_v35  ;;  %v993_v35 = vld [vmem:[#allocation8 + $0xc] sm:$0xf] }
 0x4ff   : > { %1788 = vmatprep.subr.bf16.mxu0 %v2402_v36 }
 0x502   : > { %1790 = vmatpush3.bf16.msra.mxu0 %v2411_v52 }
 0x503   : > { %1792 = vmatprep.subr.bf16.mxu0 %v2414_v53 }
 0x506   : > { %1794 = vmatpush3.bf16.msra.mxu0 %v2740_v50 }
 0x507   : > { %1796 = vmatprep.subr.bf16.mxu0 %v2741_v28 }
 0x50a   : > { %1798 = vmatpush3.bf16.msra.mxu0 %v2742_v55 }
 0x50b   : > { %1800 = vmatprep.subr.bf16.mxu0 %v2743_v0 }
 0x50e   : > { %1802 = vmatpush3.bf16.msra.mxu0 %v2744_v1 }
 0x511   : > { %1068 = vmatmul.mubr.f32.vlgmr.msra.gmra.mrb[8].mxu0 %v916_v59 }
 0x5c4   : > { %v1349_v17 = vpop.f32.mrb[6].mxu0 }
 0x5c5   : > { %v1350_v18 = vpop.f32.mrb[7].mxu0 }
 0x5c6   : > { %v1351_v40 = vadd.f32 %v1350_v18, %v1349_v17 }
 0x5c8   : > { %v994_v36 = vmul.f32 %v1351_v40, %v993_v35 }
 0x5ca   : > { %v995_v45 = vsel %vm535_vm0, %v994_v36, 0.0 }
 0x5cb   : > { %v996_v52 = vrot.slane %v995_v45, 4 }
 0x5cd   : > { %v997_v53 = vadd.f32 %v996_v52, %v995_v45 }
 0x5cf   : > { %v998_v58 = vrot.slane %v997_v53, 2 }
 0x5d1   : > { %v999_v60 = vadd.f32 %v998_v58, %v997_v53 }
 0x5d3   : > { %v1000_v4 = vrot.slane %v999_v60, 1 }
 0x5d5   : > { %v1001_v6 = vadd.f32 %v1000_v4, %v999_v60 }
 0x5d7   : > { %v1002_v9 = vadd.f32 %v1001_v6, %v849_v54 }
 0x5e4   : > { %v1384_v21 = vpop.f32.mrb[8].mxu0 }
 0x5e5   : > { %v1385_v22 = vpop.f32.mrb[9].mxu0 }
 0x5e6   : > { %v1386_v34 = vadd.f32 %v1385_v22, %v1384_v21 }
 0x5e8   : > { %v1074_v46 = vmul.f32 %v1386_v34, %v1073_v33 }
 0x5ea   : > { %v1075_v47 = vsel %vm535_vm0, %v1074_v46, 0.0 }
 0x5eb   : > { %v1076_v56 = vrot.slane %v1075_v47, 4 }
 0x5ed   : > { %v1077_v62 = vadd.f32 %v1076_v56, %v1075_v47 }
 0x5ef   : > { %v1078_v11 = vrot.slane %v1077_v62, 2 }
 0x5f1   : > { %v1079_v16 = vadd.f32 %v1078_v11, %v1077_v62 }
 0x5f3   : > { %v1080_v29 = vrot.slane %v1079_v16, 1 }
 0x5f5   : > { %v1081_v57 = vadd.f32 %v1080_v29, %v1079_v16 }
 0x5f7   : > { %v1082_v30 = vadd.f32 %v1081_v57, %v1002_v9 }
 0x5f9   : > { %v1084_v38 = vadd.f32 %v1083_v63, %v1082_v30 }
 0x5fb   : > { %1085 = vst [vmem:[%s283_s27] sm:$0x1] %v1084_v38 }
 0x5fc   : > { %2012 = shalt.err (!%p2009_p4)
}
 0x5fd   : > { %s2013_s16 = scalar_lea.hbm %s2663_s10, 16  ;;  %s2017_s23 = scalar_lea.hbm %s2712_s5, 32 }
 0x5fe   : > { %p2014_p0 = scmp.ne.s32.totalorder %s2663_s10, %s2013_s16  ;;  %p2018_p8 = scmp.lt.u32.totalorder %s2663_s10, %s2712_s5 }
 0x5ff   : > { %p2019_p13 = scmp.lt.u32.totalorder %s2017_s23, %s2013_s16  ;;  %p2021_p10 = scmp.lt.u32.totalorder %s2013_s16, %s2663_s10 }
 0x600   : > { %p2015_p9 = pnand %p2014_p0, %p2256_p5 }
 0x601   : > { %p2020_p6 = por %p2019_p13, %p2018_p8 }
 0x602   : > { %p2016_p11 = pneg %p2015_p9 }
 0x603   : > { %p2022_p3 = por %p2021_p10, %p2020_p6 }
 0x605   : > { %p2023_p7 = pnand %p2022_p3, %p2016_p11 }
 0x607   : > { %2026 = shalt.err (!%p2023_p7)
}
 0x608   : > { %1817 = dma.vmem_to_hbm [thread:$0]  (%p2256_p5), %s2665_s28, 16, %s2663_s10, %s1087_s8  }
 0x609 PF: > { %s1111_s14 = sand.u32 1, %s2061_s18   ;;  %p2745_p12 = scmp.ne.s32.totalorder %s2722_s25, 0 }
 0x60a   : > { %p2746_p2 = scmp.ge.s32.totalorder %s2073_s21, 2  ;;  %s1112_s27 = scalar_lea.sflag [#allocation4], %s1111_s14 }
 0x60c   : > { %p1834_p1 = pnand %p2746_p2, %p2745_p12 }
 0x60e   : > { %2056 = dma.done.wait (!%p1834_p1), %s1112_s27, 16  }
 0x60f   : > { %2058 = vsyncadd (!%p1834_p1), %s1112_s27, 4294967280  ;;  %p20_p4 = scmp.ge.s32.totalorder %s2224_s30, 4   ;;  %s2747_s18 = smov %s2065_s19 }
 0x610   : > { %s2748_s19 = smov %s2069_s20  ;;  %s2749_s20 = smov %s2252_s29 }
 0x611   : > { %s2750_s21 = smov %s2224_s30  ;;  %22 = sbr.rel (!%p20_p4) target bundleno = 7 (0x7), region = 97 }
 0x618   :  { %1116 = vsyncpa [#allocation3], 1 }
 0x619   :  { %1118 = vsyncpa [#allocation3 + $0x1], 1 }
 0x61a   :  { %1119 = vsyncpa [#allocation6], 1 }
 0x61b   :  { %1120 = vsyncpa [#allocation9], 1 }
 0x61c   :  { %1121 = vsyncpa [#allocation4], 1 }
 0x61d   :  { %1123 = vsyncpa [#allocation4 + $0x1], 1 }

</bundles_post_ra>
